<compile_context>
chip_gen: v7x
topology: tpu7x:2x2x1
jax: 0.10.0
libtpu: 0.0.40
codegen_flags: <defaults>
</compile_context>

<pallas_src>
import jax
import jax.numpy as jnp
from jax.experimental import pallas as pl
from jax.experimental.pallas import tpu as pltpu


def _round_up(n: int, m: int) -> int:
    return ((n + m - 1) // m) * m


def _cdiv(a: int, b: int) -> int:
    return (a + b - 1) // b


def policy_net_kernel(x_ref, w1t_ref, b1_ref, w2t_ref, b2_ref, out_ref):
    """One batch tile, batch-major layout.

    x_ref   : [tb, state_dim]        input rows
    w1t_ref : [state_dim, hidden]    fc1 weight, transposed to [in, out]
    b1_ref  : [1, hidden]            fc1 bias (row)
    w2t_ref : [hidden, action_dim]   fc2 weight, transposed to [in, out]
    b2_ref  : [1, action_dim]        fc2 bias (row)
    out_ref : [tb, action_dim]       softmax probabilities
    """
    # fc1 + ReLU on the MXU (f32 accumulation, full precision).
    h = jnp.dot(x_ref[...], w1t_ref[...],
                preferred_element_type=jnp.float32,
                precision=jax.lax.Precision.HIGHEST)
    h = jnp.maximum(h + b1_ref[...], 0.0)

    # fc2 on the MXU, then an exact numerically-stable softmax over actions.
    logits = jnp.dot(h, w2t_ref[...],
                     preferred_element_type=jnp.float32,
                     precision=jax.lax.Precision.HIGHEST)
    logits = logits + b2_ref[...]
    m = jnp.max(logits, axis=-1, keepdims=True)
    e = jnp.exp(logits - m)
    out_ref[...] = (e / jnp.sum(e, axis=-1, keepdims=True)).astype(out_ref.dtype)


def policy_net_forward(x, w1, b1, w2, b2, *, block_b=8192):
    """Forward pass of PolicyNet.  Parameters use the PyTorch nn.Linear layout:
      x : [B, state_dim]        w1: [hidden, state_dim]   b1: [hidden]
      w2: [action_dim, hidden]  b2: [action_dim]
    Returns [B, action_dim] action probabilities (softmax over dim=1).
    """
    x = jnp.asarray(x, jnp.float32)
    B, state_dim = x.shape
    hidden = w1.shape[0]
    action_dim = w2.shape[0]

    # nn.Linear computes x @ W.T + b; pre-transpose the (tiny) weights once so
    # the kernel does plain [tb, K] @ [K, N] dots.  This is a few KiB, not a
    # per-row HBM pass like the old x / output transposes.
    w1t = jnp.asarray(w1, jnp.float32).T                   # [state_dim, hidden]
    b1r = jnp.asarray(b1, jnp.float32).reshape(1, hidden)
    w2t = jnp.asarray(w2, jnp.float32).T                   # [hidden, action_dim]
    b2r = jnp.asarray(b2, jnp.float32).reshape(1, action_dim)

    # Batch tiling.  Typical RL batches fit a single full-extent tile: no grid
    # iteration overhead, no padding copy.  Very large batches get an EVEN
    # number of still-large tiles (>= 2) so "parallel" can split them over
    # v7x's two TensorCores.
    if B <= block_b:
        n_tiles, tb, b_pad = 1, B, B
        xp = x
    else:
        n_tiles = 2 * _cdiv(B, 2 * block_b)
        tb = _round_up(_cdiv(B, n_tiles), 8)               # sublane multiple
        b_pad = n_tiles * tb
        xp = jnp.pad(x, ((0, b_pad - B), (0, 0))) if b_pad != B else x

    # VMEM budget: batch-major [tb, *] buffers lane-pad their minor dim to 128
    # (~512 B per row per buffer).  Double-buffered input + output plus ~3 live
    # intermediates ~= 7 * 512 * tb bytes.  Floor at the v5e 16 MiB default
    # scoped limit, cap well under v7x's 64 MiB physical VMEM per TC.
    footprint = 7 * 512 * tb + (1 << 20)
    vmem_limit = int(min(max(footprint, 16 << 20), 48 << 20))

    out = pl.pallas_call(
        policy_net_kernel,
        out_shape=jax.ShapeDtypeStruct((b_pad, action_dim), jnp.float32),
        grid=(n_tiles,),
        in_specs=[
            pl.BlockSpec((tb, state_dim), lambda i: (i, 0)),        # batch tile
            pl.BlockSpec((state_dim, hidden), lambda i: (0, 0)),    # weights / biases
            pl.BlockSpec((1, hidden), lambda i: (0, 0)),            #   stay resident
            pl.BlockSpec((hidden, action_dim), lambda i: (0, 0)),   #   in VMEM across
            pl.BlockSpec((1, action_dim), lambda i: (0, 0)),        #   batch tiles
        ],
        out_specs=pl.BlockSpec((tb, action_dim), lambda i: (i, 0)),
        compiler_params=pltpu.CompilerParams(
            dimension_semantics=("parallel",),   # 2-TC split on v7x; no-op otherwise
            vmem_limit_bytes=vmem_limit,
        ),
    )(xp, w1t, b1r, w2t, b2r)

    return out[:B] if b_pad != B else out


def _ref_forward(x, w1, b1, w2, b2):
    h = jnp.maximum(
        jnp.dot(x, w1.T, precision=jax.lax.Precision.HIGHEST) + b1, 0.0)
    logits = jnp.dot(h, w2.T, precision=jax.lax.Precision.HIGHEST) + b2
    return jax.nn.softmax(logits, axis=1)


def _make_params(key, state_dim, hidden_dim, action_dim):
    k1, k2, k3, k4 = jax.random.split(key, 4)
    bound1 = 1.0 / (state_dim ** 0.5)
    w1 = jax.random.uniform(k1, (hidden_dim, state_dim), jnp.float32, -bound1, bound1)
    b1 = jax.random.uniform(k2, (hidden_dim,), jnp.float32, -bound1, bound1)
    bound2 = 1.0 / (hidden_dim ** 0.5)
    w2 = jax.random.uniform(k3, (action_dim, hidden_dim), jnp.float32, -bound2, bound2)
    b2 = jax.random.uniform(k4, (action_dim,), jnp.float32, -bound2, bound2)
    return w1, b1, w2, b2


if __name__ == "__main__":
    key = jax.random.PRNGKey(0)

    # --- Test 1: CartPole-like policy (single full-extent tile, no pad) ---
    batch, state_dim, hidden_dim, action_dim = 8, 4, 32, 2
    kx, kp, key = jax.random.split(key, 3)
    x = jax.random.normal(kx, (batch, state_dim), dtype=jnp.float32)
    w1, b1, w2, b2 = _make_params(kp, state_dim, hidden_dim, action_dim)

    out = jax.block_until_ready(policy_net_forward(x, w1, b1, w2, b2))
    ref = _ref_forward(x, w1, b1, w2, b2)
    assert out.shape == (batch, action_dim)
    assert jnp.allclose(out, ref, atol=1e-4, rtol=1e-4), "mismatch vs reference (A=2)"
    assert jnp.allclose(jnp.sum(out, axis=1), 1.0, atol=1e-5), "rows must sum to 1 (A=2)"

    # --- Test 2: three actions, B not a multiple of 8 (still one full-extent tile) ---
    batch2, state_dim2, hidden_dim2, action_dim2 = 300, 4, 32, 3
    kx2, kp2, key = jax.random.split(key, 3)
    x2 = jax.random.normal(kx2, (batch2, state_dim2), dtype=jnp.float32)
    w1b, b1b, w2b, b2b = _make_params(kp2, state_dim2, hidden_dim2, action_dim2)

    out2 = jax.block_until_ready(policy_net_forward(x2, w1b, b1b, w2b, b2b))
    ref2 = _ref_forward(x2, w1b, b1b, w2b, b2b)
    assert out2.shape == (batch2, action_dim2)
    assert jnp.allclose(out2, ref2, atol=1e-4, rtol=1e-4), "mismatch vs reference (A=3)"
    assert jnp.allclose(jnp.sum(out2, axis=1), 1.0, atol=1e-5), "rows must sum to 1 (A=3)"

    # --- Test 3: exercise the multi-tile (even grid) + padding path at toy size.
    # block_b is lowered ONLY to hit the gridded code path in-test; the
    # production default stays 8192 (never grid with tiny tiles in real use).
    batch3 = 1000
    kx3, kp3, key = jax.random.split(key, 3)
    x3 = jax.random.normal(kx3, (batch3, state_dim), dtype=jnp.float32)
    w1c, b1c, w2c, b2c = _make_params(kp3, state_dim, hidden_dim, action_dim)

    out3 = jax.block_until_ready(
        policy_net_forward(x3, w1c, b1c, w2c, b2c, block_b=256))  # grid=(4,), tb=256
    ref3 = _ref_forward(x3, w1c, b1c, w2c, b2c)
    assert out3.shape == (batch3, action_dim)
    assert jnp.allclose(out3, ref3, atol=1e-4, rtol=1e-4), "mismatch vs reference (grid)"
    assert jnp.allclose(jnp.sum(out3, axis=1), 1.0, atol=1e-5), "rows must sum to 1 (grid)"

    print("KERNEL_OK")
</pallas_src>

<mosaic_0001>
module attributes {stable_mosaic.version = 11 : i64} {
  func.func @policy_net_kernel(%arg0: i32, %arg1: memref<8x4xf32, #tpu.memory_space<vmem>>, %arg2: memref<4x32xf32, #tpu.memory_space<vmem>>, %arg3: memref<1x32xf32, #tpu.memory_space<vmem>>, %arg4: memref<32x2xf32, #tpu.memory_space<vmem>>, %arg5: memref<1x2xf32, #tpu.memory_space<vmem>>, %arg6: memref<8x2xf32, #tpu.memory_space<vmem>>) attributes {dimension_semantics = [#tpu.dimension_semantics<parallel>], iteration_bounds = array<i64: 1>, scalar_prefetch = 0 : i64, scratch_operands = 0 : i64, tpu.core_type = #tpu.core_type<tc>, window_params = [{transform_indices = @transform_0, window_bounds = array<i64: 8, 4>}, {pipeline_mode = #tpu.pipeline_mode<synchronous>, transform_indices = @transform_1, window_bounds = array<i64: 4, 32>}, {pipeline_mode = #tpu.pipeline_mode<synchronous>, transform_indices = @transform_2, window_bounds = array<i64: 1, 32>}, {pipeline_mode = #tpu.pipeline_mode<synchronous>, transform_indices = @transform_3, window_bounds = array<i64: 32, 2>}, {pipeline_mode = #tpu.pipeline_mode<synchronous>, transform_indices = @transform_4, window_bounds = array<i64: 1, 2>}, {transform_indices = @transform_5, window_bounds = array<i64: 8, 2>}]} {
    %c0 = arith.constant 0 : index
    %c0_0 = arith.constant 0 : index
    %0 = vector.load %arg1[%c0, %c0_0] : memref<8x4xf32, #tpu.memory_space<vmem>>, vector<8x4xf32>
    %c0_1 = arith.constant 0 : index
    %c0_2 = arith.constant 0 : index
    %1 = vector.load %arg2[%c0_1, %c0_2] : memref<4x32xf32, #tpu.memory_space<vmem>>, vector<4x32xf32>
    %cst = arith.constant dense<0.000000e+00> : vector<8x32xf32>
    %2 = tpu.matmul %0, %1, %cst {dimension_numbers = #tpu.dot_dimension_numbers<[1], [0], [0], [1], [0, 0, 1, 1], [], []>, precision = #tpu.contract_precision<fp32>} : vector<8x4xf32>, vector<4x32xf32>, vector<8x32xf32> -> vector<8x32xf32>
    %c0_3 = arith.constant 0 : index
    %c0_4 = arith.constant 0 : index
    %3 = vector.load %arg3[%c0_3, %c0_4] : memref<1x32xf32, #tpu.memory_space<vmem>>, vector<1x32xf32>
    %4 = vector.broadcast %3 : vector<1x32xf32> to vector<8x32xf32>
    %5 = arith.addf %2, %4 : vector<8x32xf32>
    %cst_5 = arith.constant 0.000000e+00 : f32
    %6 = vector.broadcast %cst_5 : f32 to vector<8x32xf32>
    %7 = arith.maximumf %5, %6 : vector<8x32xf32>
    %c0_6 = arith.constant 0 : index
    %c0_7 = arith.constant 0 : index
    %8 = vector.load %arg4[%c0_6, %c0_7] : memref<32x2xf32, #tpu.memory_space<vmem>>, vector<32x2xf32>
    %cst_8 = arith.constant dense<0.000000e+00> : vector<8x2xf32>
    %9 = tpu.matmul %7, %8, %cst_8 {dimension_numbers = #tpu.dot_dimension_numbers<[1], [0], [0], [1], [0, 0, 1, 1], [], []>, precision = #tpu.contract_precision<fp32>} : vector<8x32xf32>, vector<32x2xf32>, vector<8x2xf32> -> vector<8x2xf32>
    %c0_9 = arith.constant 0 : index
    %c0_10 = arith.constant 0 : index
    %10 = vector.load %arg5[%c0_9, %c0_10] : memref<1x2xf32, #tpu.memory_space<vmem>>, vector<1x2xf32>
    %11 = vector.broadcast %10 : vector<1x2xf32> to vector<8x2xf32>
    %12 = arith.addf %9, %11 : vector<8x2xf32>
    %cst_11 = arith.constant dense<0xFF800000> : vector<8xf32>
    %13 = vector.multi_reduction <maximumf>, %12, %cst_11 [1] : vector<8x2xf32> to vector<8xf32>
    %14 = vector.shape_cast %13 : vector<8xf32> to vector<8x1xf32>
    %15 = vector.broadcast %14 : vector<8x1xf32> to vector<8x2xf32>
    %16 = arith.subf %12, %15 : vector<8x2xf32>
    %17 = math.exp %16 : vector<8x2xf32>
    %cst_12 = arith.constant dense<0.000000e+00> : vector<8xf32>
    %18 = vector.multi_reduction <add>, %17, %cst_12 [1] : vector<8x2xf32> to vector<8xf32>
    %19 = vector.shape_cast %18 : vector<8xf32> to vector<8x1xf32>
    %20 = vector.broadcast %19 : vector<8x1xf32> to vector<8x2xf32>
    %21 = arith.divf %17, %20 : vector<8x2xf32>
    %c0_13 = arith.constant 0 : index
    %c0_14 = arith.constant 0 : index
    %22 = vector.load %arg6[%c0_13, %c0_14] : memref<8x2xf32, #tpu.memory_space<vmem>>, vector<8x2xf32>
    tpu.vector_store %arg6[%c0_13, %c0_14], %21 {strides = array<i32>} : memref<8x2xf32, #tpu.memory_space<vmem>>, vector<8x2xf32>,
    return
  }
  func.func @transform_0(%arg0: i32) -> (i32, i32) {
    %c0_i32 = arith.constant 0 : i32
    %c0_i32_0 = arith.constant 0 : i32
    return %arg0, %c0_i32 : i32, i32
  }
  func.func @transform_1(%arg0: i32) -> (i32, i32) {
    %c0_i32 = arith.constant 0 : i32
    %c0_i32_0 = arith.constant 0 : i32
    %c0_i32_1 = arith.constant 0 : i32
    return %c0_i32, %c0_i32_0 : i32, i32
  }
  func.func @transform_2(%arg0: i32) -> (i32, i32) {
    %c0_i32 = arith.constant 0 : i32
    %c0_i32_0 = arith.constant 0 : i32
    %c0_i32_1 = arith.constant 0 : i32
    return %c0_i32, %c0_i32_0 : i32, i32
  }
  func.func @transform_3(%arg0: i32) -> (i32, i32) {
    %c0_i32 = arith.constant 0 : i32
    %c0_i32_0 = arith.constant 0 : i32
    %c0_i32_1 = arith.constant 0 : i32
    return %c0_i32, %c0_i32_0 : i32, i32
  }
  func.func @transform_4(%arg0: i32) -> (i32, i32) {
    %c0_i32 = arith.constant 0 : i32
    %c0_i32_0 = arith.constant 0 : i32
    %c0_i32_1 = arith.constant 0 : i32
    return %c0_i32, %c0_i32_0 : i32, i32
  }
  func.func @transform_5(%arg0: i32) -> (i32, i32) {
    %c0_i32 = arith.constant 0 : i32
    %c0_i32_0 = arith.constant 0 : i32
    return %arg0, %c0_i32 : i32, i32
  }
}

</mosaic_0001>

<bundles_post_ra>
// kernel: tpu_custom_call.1
= control target key start
LH: loop header
LB: loop body
LE: loop exit
PB: predicated region body
PF: predicated region fallthrough
CT: control target
= control target key end

     0   :  { %vm33_vm0 = vcmask 1043456   ;;  %vm29_vm1 = vcmask 31744   ;;  %v1204_v0 = vmov 0.0   ;;  %vm1205_vm2 = vmmov 0   ;;  %s1309_s1 = inlined_call_operand.vmem [shape: f32[4,32], index: 1, kind: input, shape index: {}]   ;;  %s1310_s0 = inlined_call_operand.vmem [shape: f32[8,4], index: 0, kind: input, shape index: {}]   ;;  %s1311_s3 = inlined_call_operand.vmem [shape: f32[32,2], index: 3, kind: input, shape index: {}]   ;;  %s1312_s2 = inlined_call_operand.vmem [shape: f32[1,32], index: 2, kind: input, shape index: {}]   ;;  %s1313_s4 = inlined_call_operand.vmem [shape: f32[1,2], index: 4, kind: input, shape index: {}]   ;;  %s1314_s5 = inlined_call_operand.vmem [shape: f32[8,2], index: 5, kind: output, shape index: {}]  }
   0x1   :  { %1050 = vmatprep.subr.mxu0 %v1204_v0  ;;  %v21_v1 = vld [vmem:[%s1309_s1] sm:$0xf]  ;;  %1052 = vmatprep.mubr.msk.f32.mxu0 %vm1205_vm2, %v1204_v0  ;;  %v485_v16 = vld [vmem:[%s1311_s3 + $0x8] sm:$0xff]  ;;  %v486_v21 = vld [vmem:[%s1311_s3 + $0x10] sm:$0xff]  ;;  %v1206_v26 = vmov 0.0|0.0   ;;  %vm495_vm3 = vcmask 261120  }
   0x2   :  { %v20_v2 = vld [vmem:[%s1310_s0] sm:$0xff]  ;;  %v35_v3 = vsel %vm33_vm0, %v21_v1, 0  ;;  %1045 = vmatprep.subr.mxu1 %v1204_v0  ;;  %1047 = vmatprep.mubr.msk.f32.mxu1 %vm1205_vm2, %v1204_v0  ;;  %v503_v18 = vand.u32 4294901760, %v485_v16  ;;  %v487_v22 = vld [vmem:[%s1311_s3 + $0x18] sm:$0xff]  ;;  %v506_v24 = vand.u32 4294901760, %v486_v21  ;;  %vm984_vm4 = vcmask 15360  }
   0x3   :  { %v31_v4 = vsel %vm29_vm1, %v20_v2, 0  ;;  %v38_v5 = vand.u32 4294901760, %v35_v3  ;;  %v484_v15 = vld [vmem:[%s1311_s3] sm:$0xff]  ;;  %v509_v25 = vand.u32 4294901760, %v487_v22 }
   0x4   :  { %v103_v6 = vand.u32 4294901760, %v31_v4  ;;  %v500_v17 = vand.u32 4294901760, %v484_v15  ;;  %v587_v20 = vsub.f32 %v485_v16, %v503_v18  ;;  %v594_v27 = vsub.f32 %v486_v21, %v506_v24  ;;  %v1001_v50 = vld [vmem:[%s1312_s2] ss:$0 sm:$0xff] }
   0x5   :  { %v115_v7 = vsub.f32 %v35_v3, %v38_v5  ;;  %1046 = vmatpush3.msra.mxu1 %v38_v5  ;;  %v601_v28 = vsub.f32 %v487_v22, %v509_v25  ;;  %v1145_v33 = vpack.c.bf16 %v509_v25, %v506_v24  ;;  %v1002_v1 = vld [vmem:[%s1313_s4] ss:$0 sm:$0xff] }
   0x6   :  { %v104_v8 = vsub.f32 %v31_v4, %v103_v6  ;;  %v580_v19 = vsub.f32 %v484_v15, %v500_v17  ;;  %1153 = vmatprep.subr.bf16.mxu1 %v1206_v26  ;;  %v1142_v30 = vpack.c.bf16 %v503_v18, %v500_v17  ;;  %v588_v32 = vand.u32 4294901760, %v587_v20 }
   0x7   :  { %v116_v9 = vand.u32 4294901760, %v115_v7  ;;  %v1157_v29 = vpack.c.bf16 %v601_v28, %v594_v27  ;;  %v595_v38 = vand.u32 4294901760, %v594_v27  ;;  %v602_v39 = vand.u32 4294901760, %v601_v28 }
   0x8   :  { %v105_v10 = vand.u32 4294901760, %v104_v8  ;;  %v1154_v23 = vpack.c.bf16 %v587_v20, %v580_v19  ;;  %v581_v31 = vand.u32 4294901760, %v580_v19  ;;  %v589_v35 = vsub.f32 %v587_v20, %v588_v32 }
   0x9   :  { %v117_v11 = vsub.f32 %v115_v7, %v116_v9  ;;  %v596_v41 = vsub.f32 %v594_v27, %v595_v38  ;;  %v603_v42 = vsub.f32 %v601_v28, %v602_v39  ;;  %v1169_v47 = vpack.c.bf16 %v602_v39, %v595_v38 }
   0xa   :  { %v106_v12 = vsub.f32 %v104_v8, %v105_v10  ;;  %v582_v34 = vsub.f32 %v580_v19, %v581_v31  ;;  %v590_v37 = vand.u32 4294901760, %v589_v35  ;;  %v1166_v43 = vpack.c.bf16 %v588_v32, %v581_v31 }
   0xb   :  { %v118_v13 = vand.u32 4294901760, %v117_v11  ;;  %v597_v44 = vand.u32 4294901760, %v596_v41  ;;  %v604_v45 = vand.u32 4294901760, %v603_v42 }
   0xc   :  { %v107_v14 = vand.u32 4294901760, %v106_v12  ;;  %v583_v36 = vand.u32 4294901760, %v582_v34 }
   0xd   :  { %1051 = vmatpush3.msra.mxu0 %v118_v13  ;;  %v1151_v46 = vpack.c.bf16 %v604_v45, %v597_v44 }
   0xe   :  { %1048 = vmatmul.mubr.f32.vlgmr.msra.gmra.mrb[0].mxu1 %v107_v14  ;;  %1053 = vmatmul.mubr.f32.vlgmr.msra.gmra.mrb[0].mxu0 %v103_v6  ;;  %v1148_v40 = vpack.c.bf16 %v590_v37, %v583_v36 }
   0xf   :  { %1055 = vmatprep.subr.mxu0 %v1204_v0  ;;  %1057 = vmatprep.mubr.msk.f32.mxu0 %vm1205_vm2, %v1204_v0 }
  0x10   :  { %1056 = vmatpush3.msra.mxu0 %v115_v7  ;;  %1105 = vmatprep.mubr.msk.f32.mxu1 %vm1205_vm2, %v1204_v0 }
  0x11   :  { %1060 = vmatprep.subr.mxu0 %v1204_v0  ;;  %1155 = vmatpush3.bf16.msra.mxu1 %v1154_v23 }
  0x12   :  { %1156 = vmatprep.subr.bf16.mxu1 %v1206_v26 }
  0x15   :  { %1158 = vmatpush3.bf16.msra.mxu1 %v1157_v29 }
  0x16   :  { %1058 = vmatmul.mubr.f32.vlgmr.msra.gmra.mrb[0].mxu0 %v104_v8  ;;  %1159 = vmatprep.subr.bf16.mxu1 %v1206_v26 }
  0x17   :  { %1061 = vmatpush3.msra.mxu0 %v38_v5  ;;  %1062 = vmatprep.mubr.msk.f32.mxu0 %vm1205_vm2, %v1204_v0 }
  0x18   :  { %1065 = vmatprep.subr.mxu0 %v1204_v0 }
  0x1e   :  { %1063 = vmatmul.mubr.f32.vlgmr.msra.gmra.mrb[0].mxu0 %v105_v10 }
  0x1f   :  { %1066 = vmatpush3.msra.mxu0 %v116_v9  ;;  %1067 = vmatprep.mubr.msk.f32.mxu0 %vm1205_vm2, %v1204_v0 }
  0x20   :  { %1070 = vmatprep.subr.mxu0 %v1204_v0 }
  0x26   :  { %1068 = vmatmul.mubr.f32.vlgmr.msra.gmra.mrb[0].mxu0 %v103_v6 }
  0x27   :  { %1071 = vmatpush3.msra.mxu0 %v38_v5  ;;  %1072 = vmatprep.mubr.msk.f32.mxu0 %vm1205_vm2, %v1204_v0 }
  0x28   :  { %1141 = vmatprep.subr.bf16.mxu0 %v1206_v26 }
  0x2e   :  { %1073 = vmatmul.mubr.f32.vlgmr.msra.gmra.mrb[0].mxu0 %v103_v6 }
  0x2f   :  { %1083 = vmatprep.mubr.msk.f32.mxu0 %vm1205_vm2, %v1204_v0  ;;  %1143 = vmatpush3.bf16.msra.mxu0 %v1142_v30 }
  0x30   :  { %1144 = vmatprep.subr.bf16.mxu0 %v1206_v26 }
  0x33   :  { %1146 = vmatpush3.bf16.msra.mxu0 %v1145_v33 }
  0x34   :  { %1147 = vmatprep.subr.bf16.mxu0 %v1206_v26 }
  0xe1   :  { %v109_v48 = vpop.f32.mrb[0].mxu1 }
  0xe2   :  { %v1049_v49 = vpop.f32.mrb[1].mxu1  ;;  %v110_v51 = vadd.f32 %v1001_v50, %v109_v48 }
 0x101   :  { %v479_v52 = vpop.f32.mrb[0].mxu0 }
 0x102   :  { %v1178_v53 = vadd.f32 %v479_v52, %v110_v51  ;;  %v1074_v54 = vpop.f32.mrb[1].mxu0 }
 0x104   :  { %v483_v55 = vmax.f32 %v1178_v53, 0.0 }
 0x106   :  { %v497_v56 = vsel %vm495_vm3, %v483_v55, 0 }
 0x107   :  { %v568_v57 = vand.u32 4294901760, %v497_v56 }
 0x109   :  { %v569_v58 = vsub.f32 %v497_v56, %v568_v57 }
 0x10b   :  { %v570_v59 = vand.u32 4294901760, %v569_v58  ;;  %1106 = vmatmul.mubr.f32.vlgmr.msra.gmra.mrb[2].mxu1 %v569_v58 }
 0x10c   :  { %1161 = vmatpush3.bf16.msra.mxu1 %v1142_v30  ;;  %1116 = vmatprep.mubr.msk.f32.mxu1 %vm1205_vm2, %v1204_v0 }
 0x10d   :  { %1162 = vmatprep.subr.bf16.mxu1 %v1206_v26  ;;  %v571_v60 = vsub.f32 %v569_v58, %v570_v59 }
 0x10f   :  { %v572_v61 = vand.u32 4294901760, %v571_v60 }
 0x110   :  { %1164 = vmatpush3.bf16.msra.mxu1 %v1145_v33 }
 0x111   :  { %1084 = vmatmul.mubr.f32.vlgmr.msra.gmra.mrb[2].mxu0 %v572_v61  ;;  %1165 = vmatprep.subr.bf16.mxu1 %v1206_v26 }
 0x112   :  { %1149 = vmatpush3.bf16.msra.mxu0 %v1148_v40  ;;  %1094 = vmatprep.mubr.msk.f32.mxu0 %vm1205_vm2, %v1204_v0 }
 0x113   :  { %1117 = vmatmul.mubr.f32.vlgmr.msra.gmra.mrb[2].mxu1 %v570_v59  ;;  %1150 = vmatprep.subr.bf16.mxu0 %v1206_v26 }
 0x114   :  { %1167 = vmatpush3.bf16.msra.mxu1 %v1166_v43  ;;  %1127 = vmatprep.mubr.msk.f32.mxu1 %vm1205_vm2, %v1204_v0 }
 0x115   :  { %1168 = vmatprep.subr.bf16.mxu1 %v1206_v26 }
 0x116   :  { %1152 = vmatpush3.bf16.msra.mxu0 %v1151_v46 }
 0x118   :  { %1170 = vmatpush3.bf16.msra.mxu1 %v1169_v47 }
 0x119   :  { %1095 = vmatmul.mubr.f32.vlgmr.msra.gmra.mrb[2].mxu0 %v568_v57  ;;  %1171 = vmatprep.subr.bf16.mxu1 %v1206_v26 }
 0x11b   :  { %1128 = vmatmul.mubr.f32.vlgmr.msra.gmra.mrb[2].mxu1 %v568_v57 }
 0x11c   :  { %1173 = vmatpush3.bf16.msra.mxu1 %v1142_v30  ;;  %1138 = vmatprep.mubr.msk.f32.mxu1 %vm1205_vm2, %v1204_v0 }
 0x11d   :  { %1174 = vmatprep.subr.bf16.mxu1 %v1206_v26 }
 0x120   :  { %1176 = vmatpush3.bf16.msra.mxu1 %v1145_v33 }
 0x123   :  { %1139 = vmatmul.mubr.f32.vlgmr.msra.gmra.mrb[2].mxu1 %v568_v57 }
 0x1ec   :  { %v665_v62 = vpop.f32.mrb[2].mxu0 }
 0x1ed   :  { %v1096_v63 = vpop.f32.mrb[3].mxu0  ;;  %v1179_v2 = vadd.f32 %v1002_v1, %v665_v62 }
 0x1f6   :  { %v980_v3 = vpop.f32.mrb[2].mxu1 }
 0x1f7   :  { %v1180_v4 = vadd.f32 %v1179_v2, %v980_v3  ;;  %v1140_v5 = vpop.f32.mrb[3].mxu1 }
 0x1f9   :  { %v985_v6 = vsel %vm984_vm4, %v1180_v4, -inf }
 0x1fa   :  { %986 = vmax.xlane.f32.xlu0 %v985_v6 }
 0x287   :  { %v987_v7 = vpop.xlane.xlu0 %986 }
 0x288   :  { %v988_v0 = vsub.f32 %v1180_v4, %v987_v7 }
 0x28a   :  { %v989_v8 = vmul.f32 1.442695, %v988_v0 }
 0x28c   :  { %1200 = vpow2.f32 %v989_v8 }
 0x296   :  { %v1201_v9 = vpop.eup %1200 }
 0x297   :  { %v991_v10 = vsel %vm984_vm4, %v1201_v9, 0.0 }
 0x298   :  { %992 = vadd.xlane.f32.xlu0 %v991_v10 }
 0x325   :  { %v993_v11 = vpop.xlane.xlu0 %992 }
 0x326   :  { %1202 = vrcp.f32 %v993_v11 }
 0x330   :  { %v1203_v12 = vpop.eup %1202 }
 0x331   :  { %v995_v13 = vmul.f32 %v1203_v12, %v1201_v9 }
 0x333   :  { %996 = vst.msk [vmem:[%s1314_s5] sm:$0xff] %vm984_vm4, %v995_v13 }

</bundles_post_ra>
